<compile_context>
chip_gen: v5e
topology: v5e:2x2
jax: 0.10.0
libtpu: 0.0.40
codegen_flags: <defaults>
</compile_context>

<pallas_src>
import jax
import jax.numpy as jnp
from jax.experimental import pallas as pl
from jax.experimental.pallas import tpu as pltpu

_LANE = 128
_MAX_TILE_N = 32768  # (2 in-streams * 2 bufs + 1 acc) * 8 sublanes * 32768 * 4B ~= 5 MiB


def _gaze_sse_kernel(pred_ref, tgt_ref, out_ref, acc_ref):
    i = pl.program_id(0)

    @pl.when(i == 0)
    def _():
        acc_ref[...] = jnp.zeros_like(acc_ref)

    # Inputs are already masked (invalid/padded columns are exactly zero in
    # both streams), so diff is zero there and contributes nothing.
    diff = pred_ref[...] - tgt_ref[...]            # (D, TN) f32
    acc_ref[...] = acc_ref[...] + diff * diff      # pure VPU elementwise accumulate

    @pl.when(i == pl.num_programs(0) - 1)
    def _():
        # Single final cross-lane/sublane reduce, scalar result straight to SMEM.
        out_ref[0, 0] = jnp.sum(acc_ref[...])


def gaze_vector_mse(pred, tgt, valid, loss_weight=1.0):
    """pred: (N, D), tgt: (N, K, D), valid: (N,) float {0,1}.  Returns MSE * weight."""
    N, D = pred.shape

    # Tile selection: one lane tile when N fits, else stream 32768-wide tiles.
    # Per-grid-step overhead is ~0.35 us, so tiles are as large as comfortably
    # fit the scoped-VMEM default on every generation (v5e 16 MiB is the floor).
    if N <= _MAX_TILE_N:
        tile_n = max(_LANE, ((N + _LANE - 1) // _LANE) * _LANE)
    else:
        tile_n = _MAX_TILE_N
    n_pad = ((N + tile_n - 1) // tile_n) * tile_n
    grid_n = n_pad // tile_n

    # Wrapper-side fused plumbing (one XLA fusion): mean over K, mask with
    # jnp.where (never reads-by-multiply possibly non-finite padded rows),
    # transpose N onto the lane axis, zero-pad to a lane-tile multiple.
    valid_col = valid.astype(jnp.float32)[:, None] > 0                       # (N, 1)
    pred_m = jnp.where(valid_col, pred.astype(jnp.float32), 0.0)             # (N, D)
    tgt_m = jnp.where(valid_col, tgt.astype(jnp.float32).mean(axis=1), 0.0)  # (N, D)
    pad = ((0, 0), (0, n_pad - N))
    pred_t = jnp.pad(pred_m.T, pad)                                          # (D, n_pad)
    tgt_t = jnp.pad(tgt_m.T, pad)                                            # (D, n_pad)

    sse = pl.pallas_call(
        _gaze_sse_kernel,
        out_shape=jax.ShapeDtypeStruct((1, 1), jnp.float32),
        grid=(grid_n,),
        in_specs=[
            pl.BlockSpec((D, tile_n), lambda i: (0, i)),
            pl.BlockSpec((D, tile_n), lambda i: (0, i)),
        ],
        out_specs=pl.BlockSpec(memory_space=pltpu.MemorySpace.SMEM),
        scratch_shapes=[pltpu.VMEM((D, tile_n), jnp.float32)],
        compiler_params=pltpu.CompilerParams(
            dimension_semantics=("arbitrary",)),
    )(pred_t, tgt_t)[0, 0]

    # Valid-element count and final divide stay in the wrapper fusion.
    # Parity with nn.MSELoss: empty selection -> 0/0 = NaN.
    n_elems = jnp.sum(valid.astype(jnp.float32)) * jnp.float32(D)
    return sse / n_elems * jnp.float32(loss_weight)


def gaze_vector_loss_forward(outputs, targets, indices, src_permutation_idx,
                             loss_weight=1.0):
    """Mirrors GazeVectorLoss.forward (gather glue in JAX, reduction in Pallas)."""
    # TODO(synk): at large N, fuse the gather via PrefetchScalarGridSpec +
    # pl.Element row-gather instead of materializing pred/tgt with fancy
    # indexing in the wrapper.
    tgt_regression_padding = jnp.concatenate(
        [t['regression_padding'][i] for t, (_, i) in zip(targets, indices)],
        axis=0,
    ).squeeze(1)                                               # (N,) bool
    tgt_gaze = jnp.concatenate(
        [t['gaze_vectors'][i] for t, (_, i) in zip(targets, indices)],
        axis=0,
    )                                                          # (N, K, D)
    batch_idx, src_idx = src_permutation_idx
    pred = outputs['pred_gaze_vectors'][batch_idx, src_idx]    # (N, D)

    valid = (~tgt_regression_padding).astype(jnp.float32)      # (N,)
    return gaze_vector_mse(pred, tgt_gaze, valid, loss_weight)


if __name__ == "__main__":
    key = jax.random.PRNGKey(0)
    B, Q, D, K = 2, 8, 2, 4          # batch, queries, gaze dim ('2d'), annotations
    loss_weight = 1.0

    k1, k2, k3, k4 = jax.random.split(key, 4)

    # outputs['pred_gaze_vectors'] : (B, Q, D)
    outputs = {'pred_gaze_vectors': jax.random.normal(k1, (B, Q, D), jnp.float32)}

    # per-image targets
    n_obj = [3, 5]
    targets = [
        {
            'gaze_vectors': jax.random.normal(k2, (n_obj[0], K, D), jnp.float32),
            'regression_padding': jnp.array([[False], [True], [False]], dtype=bool),
        },
        {
            'gaze_vectors': jax.random.normal(k3, (n_obj[1], K, D), jnp.float32),
            'regression_padding': jnp.array(
                [[False], [False], [True], [False], [False]], dtype=bool),
        },
    ]

    # matcher indices: (src query idx, tgt object idx) per image
    indices = [
        (jnp.array([1, 4, 6]), jnp.array([0, 2, 1])),
        (jnp.array([0, 3, 5, 7, 2]), jnp.array([4, 1, 0, 3, 2])),
    ]
    # src_permutation_idx = (batch idx, src idx) flattened
    batch_idx = jnp.concatenate([jnp.full_like(s, b) for b, (s, _) in enumerate(indices)])
    src_idx = jnp.concatenate([s for (s, _) in indices])
    src_permutation_idx = (batch_idx, src_idx)

    loss = gaze_vector_loss_forward(outputs, targets, indices,
                                    src_permutation_idx, loss_weight)
    loss = jax.block_until_ready(loss)

    # pure-JAX reference (same semantics as the PyTorch module)
    pad = jnp.concatenate(
        [t['regression_padding'][i] for t, (_, i) in zip(targets, indices)], axis=0
    ).squeeze(1)
    tgt_mean = jnp.concatenate(
        [t['gaze_vectors'][i] for t, (_, i) in zip(targets, indices)], axis=0
    ).mean(axis=1)[~pad]
    pred_ref = outputs['pred_gaze_vectors'][batch_idx, src_idx][~pad]
    ref = jnp.mean((pred_ref - tgt_mean) ** 2) * loss_weight

    assert jnp.allclose(loss, ref, rtol=1e-5, atol=1e-6), (loss, ref)
    print("KERNEL_OK")
</pallas_src>

<mosaic_0001>
module attributes {stable_mosaic.version = 11 : i64} {
  func.func @_gaze_sse_kernel(%arg0: i32, %arg1: memref<2x128xf32, #tpu.memory_space<vmem>>, %arg2: memref<2x128xf32, #tpu.memory_space<vmem>>, %arg3: memref<1x1xf32, #tpu.memory_space<smem>>, %arg4: memref<2x128xf32, #tpu.memory_space<vmem>>) attributes {dimension_semantics = [#tpu.dimension_semantics<arbitrary>], iteration_bounds = array<i64: 1>, scalar_prefetch = 0 : i64, scratch_operands = 1 : i64, tpu.core_type = #tpu.core_type<tc>, window_params = [{transform_indices = @transform_0, window_bounds = array<i64: 2, 128>}, {transform_indices = @transform_1, window_bounds = array<i64: 2, 128>}, {transform_indices = @transform_2, window_bounds = array<i64: 1, 1>}]} {
    %c0_i32 = arith.constant 0 : i32
    %0 = arith.cmpi eq, %arg0, %c0_i32 : i32
    %1 = arith.extui %0 : i1 to i32
    %c0_i32_0 = arith.constant 0 : i32
    %2 = arith.cmpi ne, %1, %c0_i32_0 : i32
    scf.if %2 {
      %cst = arith.constant 0.000000e+00 : f32
      %13 = vector.broadcast %cst : f32 to vector<2x128xf32>
      %c0_10 = arith.constant 0 : index
      %c0_11 = arith.constant 0 : index
      %14 = vector.load %arg4[%c0_10, %c0_11] : memref<2x128xf32, #tpu.memory_space<vmem>>, vector<2x128xf32>
      tpu.vector_store %arg4[%c0_10, %c0_11], %13 {strides = array<i32>} : memref<2x128xf32, #tpu.memory_space<vmem>>, vector<2x128xf32>,
    } else {
    }
    %c0 = arith.constant 0 : index
    %c0_1 = arith.constant 0 : index
    %3 = vector.load %arg1[%c0, %c0_1] : memref<2x128xf32, #tpu.memory_space<vmem>>, vector<2x128xf32>
    %c0_2 = arith.constant 0 : index
    %c0_3 = arith.constant 0 : index
    %4 = vector.load %arg2[%c0_2, %c0_3] : memref<2x128xf32, #tpu.memory_space<vmem>>, vector<2x128xf32>
    %5 = arith.subf %3, %4 : vector<2x128xf32>
    %c0_4 = arith.constant 0 : index
    %c0_5 = arith.constant 0 : index
    %6 = vector.load %arg4[%c0_4, %c0_5] : memref<2x128xf32, #tpu.memory_space<vmem>>, vector<2x128xf32>
    %7 = arith.mulf %5, %5 : vector<2x128xf32>
    %8 = arith.addf %6, %7 : vector<2x128xf32>
    %c0_6 = arith.constant 0 : index
    %c0_7 = arith.constant 0 : index
    %9 = vector.load %arg4[%c0_6, %c0_7] : memref<2x128xf32, #tpu.memory_space<vmem>>, vector<2x128xf32>
    tpu.vector_store %arg4[%c0_6, %c0_7], %8 {strides = array<i32>} : memref<2x128xf32, #tpu.memory_space<vmem>>, vector<2x128xf32>,
    %c0_i32_8 = arith.constant 0 : i32
    %10 = arith.cmpi eq, %arg0, %c0_i32_8 : i32
    %11 = arith.extui %10 : i1 to i32
    %c0_i32_9 = arith.constant 0 : i32
    %12 = arith.cmpi ne, %11, %c0_i32_9 : i32
    scf.if %12 {
      %c0_10 = arith.constant 0 : index
      %c0_11 = arith.constant 0 : index
      %13 = vector.load %arg4[%c0_10, %c0_11] : memref<2x128xf32, #tpu.memory_space<vmem>>, vector<2x128xf32>
      %14 = vector.shape_cast %13 : vector<2x128xf32> to vector<1x2x128xf32>
      %cst = arith.constant dense<0.000000e+00> : vector<1xf32>
      %15 = vector.multi_reduction <add>, %14, %cst [1, 2] : vector<1x2x128xf32> to vector<1xf32>
      %16 = vector.shape_cast %15 : vector<1xf32> to vector<1x1x1xf32>
      %17 = vector.extract %16[0, 0, 0] : f32 from vector<1x1x1xf32>
      %c0_12 = arith.constant 0 : index
      %c0_13 = arith.constant 0 : index
      %18 = memref.load %arg3[%c0_12, %c0_13] : memref<1x1xf32, #tpu.memory_space<smem>>
      memref.store %17, %arg3[%c0_12, %c0_13] : memref<1x1xf32, #tpu.memory_space<smem>>
    } else {
    }
    return
  }
  func.func @transform_0(%arg0: i32) -> (i32, i32) {
    %c0_i32 = arith.constant 0 : i32
    %c0_i32_0 = arith.constant 0 : i32
    return %c0_i32, %arg0 : i32, i32
  }
  func.func @transform_1(%arg0: i32) -> (i32, i32) {
    %c0_i32 = arith.constant 0 : i32
    %c0_i32_0 = arith.constant 0 : i32
    return %c0_i32, %arg0 : i32, i32
  }
  func.func @transform_2(%arg0: i32) -> (i32, i32) {
    %c0_i32 = arith.constant 0 : i32
    %c0_i32_0 = arith.constant 0 : i32
    %c0_i32_1 = arith.constant 0 : i32
    return %c0_i32, %c0_i32_0 : i32, i32
  }
}

</mosaic_0001>

<bundles_post_ra>
// kernel: tpu_custom_call.1
= control target key start
LH: loop header
LB: loop body
LE: loop exit
PB: predicated region body
PF: predicated region fallthrough
CT: control target
= control target key end

     0   :  { %7 = vsyncpa [#allocation4], 0  ;;  %s186_s0 = inlined_call_operand.hbm [shape: f32[2,128], index: 0, kind: input, shape index: {}]   ;;  %s187_s1 = inlined_call_operand.hbm [shape: f32[2,128], index: 1, kind: input, shape index: {}]   ;;  %s188_s2 = inlined_call_operand.hbm [shape: f32[1,1], index: 2, kind: output, shape index: {}]  }
   0x1   :  { %8 = vsyncpa [#allocation7], 0 }
   0x2   :  { %9 = vsyncpa [#allocation5], 0  ;;  %s15_s11 = sshll.u32 %s186_s0, 4  ;;  %s158_s12 = smov [#allocation3]   ;;  %s16_s11 = int_to_ptr.hbm [resolvable:$true] %s15_s11 }
   0x3   :  { %s17_s13 = sshll.u32 %s158_s12, 4  ;;  %s26_s16 = sshll.u32 %s187_s1, 4  ;;  %s18_s13 = int_to_ptr.vmem [resolvable:$true] %s17_s13  ;;  %s27_s16 = int_to_ptr.hbm [resolvable:$true] %s26_s16 }
   0x4   :  { %20 = dma.hbm_to_vmem [thread:$0]  %s16_s11, 32, %s18_s13, [#allocation4]  }
   0x5   :  { %s159_s17 = smov [#allocation6]  }
   0x6   :  { %s28_s18 = sshll.u32 %s159_s17, 4  ;;  %s29_s18 = int_to_ptr.vmem [resolvable:$true] %s28_s18 }
   0x7   :  { %31 = dma.hbm_to_vmem [thread:$0]  %s27_s16, 32, %s29_s18, [#allocation7]  }
   0x8   :  { %152 = dma.done.wait [#allocation4], 32  }
   0x9   :  { %153 = vsyncadd [#allocation4], 4294967264 }
   0xa   :  { %154 = dma.done.wait [#allocation7], 32  }
   0xb   :  { %155 = vsyncadd [#allocation7], 4294967264  ;;  %v160_v0 = vmov 0.0   ;;  %v45_v1 = vld [vmem:[#allocation3] sm:$0x3]  ;;  %vm56_vm0 = vcmask 1041408  }
   0xc   :  { %44 = vst [vmem:[#allocation2] sm:$0x3] %v160_v0  ;;  %v46_v2 = vld [vmem:[#allocation6] sm:$0x3]  ;;  %s74_s19 = sshll.u32 %s188_s2, 4  ;;  %s161_s21 = smov [#allocation8]   ;;  %s75_s19 = int_to_ptr.hbm [resolvable:$true] %s74_s19 }
   0xd   :  { %v47_v3 = vsub.f32 %v45_v1, %v46_v2 }
   0xf   :  { %v49_v5 = vmul.f32 %v47_v3, %v47_v3 }
  0x13   :  { %v48_v4 = vld [vmem:[#allocation2] sm:$0x3] }
  0x14   :  { %v50_v6 = vadd.f32 %v49_v5, %v48_v4 }
  0x16   :  { %51 = vst [vmem:[#allocation2] sm:$0x3] %v50_v6 }
  0x1d   :  { %v55_v7 = vld [vmem:[#allocation2] sm:$0x3] }
  0x1e   :  { %v57_v8 = vsel %vm56_vm0, %v55_v7, 0.0 }
  0x1f   :  { %58 = vadd.xlane.f32.xlu0 %v57_v8 }
  0x92   :  { %v59_v9 = vpop.xlane.xlu0 %58 }
  0x93   :  { %v60_v10 = vrot.slane %v59_v9, 4 }
  0x95   :  { %v61_v11 = vadd.f32 %v60_v10, %v59_v9 }
  0x97   :  { %v62_v12 = vrot.slane %v61_v11, 2 }
  0x99   :  { %v63_v13 = vadd.f32 %v62_v12, %v61_v11 }
  0x9b   :  { %v64_v14 = vrot.slane %v63_v13, 1 }
  0x9d   :  { %v65_v15 = vadd.f32 %v64_v14, %v63_v13 }
  0x9f   :  { %86 = vpush %v65_v15 }
  0xd0   :  { %s87_s20 = spop %86 }
  0xd1   :  { %68 = sst [smem:[#allocation8]] %s87_s20 }
  0xd2   :  { %77 = dma.smem_to_hbm %s161_s21, 16, %s75_s19, [#allocation5]  }
  0xd3   :  { %156 = dma.done.wait [#allocation5], 16  }
  0xd4   :  { %157 = vsyncadd [#allocation5], 4294967280 }
  0xd5   :  { %82 = sfence }
  0xd6   :  { %83 = vsyncpa [#allocation4], 1 }
  0xd7   :  { %84 = vsyncpa [#allocation7], 1 }
  0xd8   :  { %85 = vsyncpa [#allocation5], 1 }

</bundles_post_ra>
